<compile_context>
chip_gen: v7x
topology: tpu7x:2x2x1
jax: 0.10.0
libtpu: 0.0.40
codegen_flags: <defaults>
</compile_context>

<pallas_src>
import functools
import math

import jax
import jax.numpy as jnp
from jax.experimental import pallas as pl
from jax.experimental.pallas import tpu as pltpu


def _round_up(x, m):
    return ((x + m - 1) // m) * m


def _sepconv1d_kernel(*refs, kernel_size, l_tile, halo_rows):
    """One (batch, seq-tile) grid step of the 1-D conv.

    refs (K > 1):  x_ref (1, l_tile, C_in)     current seq-tile of the padded input
                   h_ref (1, halo_rows, C_in)  first rows of the *next* tile (halo)
                   w_ref (K, C_in, C_out)      conv weight, tap-major
                   o_ref (1, C_out, l_tile)    channels-first output tile
    refs (K == 1): x_ref, w_ref, o_ref.
    """
    if kernel_size > 1:
        x_ref, h_ref, w_ref, o_ref = refs
    else:
        x_ref, w_ref, o_ref = refs

    x2d = x_ref[0]                                        # (l_tile, C_in)
    c_out = o_ref.shape[1]

    # Main contribution: one aligned MXU matmul per tap.  Shifted windows are
    # built with pltpu.roll (XLU slot, otherwise idle) -- no unaligned slices,
    # no 2*l_tile concatenate.  The roll wraps the first k rows of the tile
    # into the last k output rows; that wrap is repaired below with a tiny
    # halo-delta fixup, so no full-size masks are needed either.
    acc = jnp.dot(x2d, w_ref[0], preferred_element_type=jnp.float32)
    for k in range(1, kernel_size):
        xk = pltpu.roll(x2d, shift=l_tile - k, axis=0)    # xk[i] = x2d[(i + k) % l_tile]
        acc = acc + jnp.dot(xk, w_ref[k], preferred_element_type=jnp.float32)

    # Lane-dense store: last dim of the output block is l_tile.
    o_ref[0] = acc.T.astype(o_ref.dtype)

    if kernel_size > 1:
        # Halo fixup for the last `halo_rows` output rows: replace the wrapped
        # contribution (this tile's first rows) by the true next-tile rows.
        h2d = h_ref[0]                                    # (halo_rows, C_in)
        d = h2d - x2d[:halo_rows, :]                      # halo minus wrapped rows
        row = jax.lax.broadcasted_iota(jnp.int32, (halo_rows, 1), 0)
        fix = jnp.zeros((halo_rows, c_out), jnp.float32)
        for k in range(1, kernel_size):
            dk = pltpu.roll(d, shift=halo_rows - k, axis=0)
            dk = jnp.where(row >= halo_rows - k, dk, jnp.zeros_like(dk))
            fix = fix + jnp.dot(dk, w_ref[k], preferred_element_type=jnp.float32)
        tail = acc[l_tile - halo_rows:, :] + fix          # aligned 8-row tail slice
        o_ref[0, :, l_tile - halo_rows:] = tail.T.astype(o_ref.dtype)


def _choose_l_tile(l_out, halo_rows, requested):
    """Pick the sequence-tile length.

    Must be a multiple of 8 (sublanes) and of halo_rows (so the halo block's
    index_map lands on an exact block boundary); in the multi-tile case also a
    multiple of 128 so the channels-first output store is lane-dense.
    """
    unit = max(8, halo_rows)
    if requested is None:
        # Big tiles amortize the ~0.35us/step grid overhead; a 4096-row f32
        # tile is ~0.5 MiB per buffer (~4 MiB double-buffered), far under the
        # scoped-VMEM limit on v5e/v6e/v7x.
        requested = 4096
    single = _round_up(l_out, unit)                       # whole output in one tile
    multi_unit = math.lcm(128, unit)
    if single <= max(_round_up(requested, unit), multi_unit):
        return single
    return _round_up(requested, multi_unit)


def conv1d_pallas(x, weight, padding, *, l_tile=None, compute_dtype=None):
    """1-D conv matching torch.nn.Conv1d(stride=1, bias=False).

    x:      [B, L, C_in]      channels-last (C_in on the TPU lane axis)
    weight: [C_out, C_in, K]  torch Conv1d layout
    returns [B, C_out, L_out] channels-first (torch Conv1d output layout),
            L_out = L + 2*padding - K + 1.
    """
    B, L_total, C_in = x.shape
    C_out, C_in_w, K = weight.shape
    assert C_in_w == C_in, "in_channels mismatch"
    L_out = L_total + 2 * padding - K + 1
    assert L_out > 0, "kernel does not fit the (padded) input"

    halo_rows = _round_up(K - 1, 8) if K > 1 else 0
    l_tile = _choose_l_tile(L_out, halo_rows, l_tile)
    assert l_tile % 8 == 0 and (halo_rows == 0 or l_tile % halo_rows == 0)
    num_l = -(-L_out // l_tile)
    L_out_pad = num_l * l_tile

    # Zero padding: `padding` rows up front (conv padding) plus enough rows at
    # the back that the last tile and its halo stay in bounds (and are zero).
    L_padded = L_out_pad + halo_rows
    pad_back = L_padded - padding - L_total
    assert pad_back >= 0
    # TODO(synk): fuse this concat/pad HBM pass into the kernel (seam + pad
    # masking with pl.when on boundary tiles) to save one full activation pass.
    x_padded = jnp.pad(x, ((0, 0), (padding, pad_back), (0, 0)))

    # Weight as [K, C_in, C_out]: each tap is an MXU-ready [C_in, C_out] matrix.
    w_t = jnp.transpose(weight, (2, 1, 0))
    if compute_dtype is not None:        # e.g. bf16 on v6e/v7x: halves DMA traffic
        x_padded = x_padded.astype(compute_dtype)
        w_t = w_t.astype(compute_dtype)

    in_specs = [pl.BlockSpec((1, l_tile, C_in), lambda b, l: (b, l, 0))]
    operands = [x_padded]
    if K > 1:
        halo_blocks_per_tile = l_tile // halo_rows
        in_specs.append(
            pl.BlockSpec((1, halo_rows, C_in),
                         lambda b, l: (b, (l + 1) * halo_blocks_per_tile, 0)))
        operands.append(x_padded)
    in_specs.append(pl.BlockSpec((K, C_in, C_out), lambda b, l: (0, 0, 0)))
    operands.append(w_t)

    kernel = functools.partial(_sepconv1d_kernel, kernel_size=K,
                               l_tile=l_tile, halo_rows=halo_rows)
    out = pl.pallas_call(
        kernel,
        out_shape=jax.ShapeDtypeStruct((B, C_out, L_out_pad), x.dtype),
        grid_spec=pltpu.PrefetchScalarGridSpec(
            num_scalar_prefetch=0,
            grid=(B, num_l),
            in_specs=in_specs,
            out_specs=pl.BlockSpec((1, C_out, l_tile), lambda b, l: (b, 0, l)),
        ),
        compiler_params=pltpu.CompilerParams(
            dimension_semantics=("parallel", "parallel")),
    )(*operands)

    if L_out_pad != L_out:
        out = out[:, :, :L_out]
    return out


class SepConv1dPallas:
    """JAX/Pallas equivalent of the PyTorch `SepConv1d` module (forward only)."""

    def __init__(self, emb_s, n, kernel_size, padding, weight):
        assert weight.shape == (emb_s, emb_s, kernel_size)
        self.emb_s = emb_s
        self.n = n
        self.kernel_size = kernel_size
        self.padding = padding
        self.weight = weight          # torch Conv1d layout [out_ch, in_ch, K]

    def __call__(self, x0, x1, x2, rel, *, l_tile=None, compute_dtype=None):
        # `rel` is ignored by the torch forward; kept for signature parity.
        if self.n == 0:
            xa, xb = x1, x2
        elif self.n == 1:
            xa, xb = x0, x2
        else:
            xa, xb = x0, x1
        # torch does cat(dim=1).transpose(2, 1); the kernel wants channels-last
        # [B, L, emb_s] (emb_s on lanes), so only the concat is materialized.
        x = jnp.concatenate([xa, xb], axis=1)                         # [B, 2L, emb_s]
        y = conv1d_pallas(x, self.weight, self.padding,
                          l_tile=l_tile, compute_dtype=compute_dtype)  # [B, emb_s, L_out]
        # torch's `view(-1, 1, emb_s)` on the contiguous [B, emb_s, L_out]
        # conv output is now a plain (free) reshape -- no transpose pass.
        return y.reshape(-1, 1, self.emb_s)


def _sepconv1d_ref(x0, x1, x2, n, weight, emb_s, padding):
    """Pure-JAX reference mirroring the torch forward."""
    if n == 0:
        x = jnp.concatenate([x1, x2], axis=1)
    elif n == 1:
        x = jnp.concatenate([x0, x2], axis=1)
    else:
        x = jnp.concatenate([x0, x1], axis=1)
    x = jnp.transpose(x, (0, 2, 1))                                   # [B, emb_s, L]
    y = jax.lax.conv_general_dilated(
        x, weight, window_strides=(1,), padding=[(padding, padding)],
        dimension_numbers=("NCH", "OIH", "NCH"))
    return y.reshape(-1, 1, emb_s)


if __name__ == "__main__":
    key = jax.random.PRNGKey(0)
    k0, k1, k2, k3, kw, kw1 = jax.random.split(key, 6)

    emb_s = 32
    kernel_size, padding = 3, 1
    fan_in = emb_s * kernel_size
    weight = jax.random.uniform(
        kw, (emb_s, emb_s, kernel_size), dtype=jnp.float32,
        minval=-1.0, maxval=1.0) / (fan_in ** 0.5)
    weight_k1 = jax.random.uniform(
        kw1, (emb_s, emb_s, 1), dtype=jnp.float32,
        minval=-1.0, maxval=1.0) / (emb_s ** 0.5)

    def check(out, ref):
        return (out.shape == ref.shape and out.dtype == ref.dtype
                and bool(jnp.allclose(out, ref, atol=1e-4, rtol=1e-4)))

    ok = True
    # (B, L, l_tile): a tiny single-tile case and a multi-tile case that
    # exercises the halo fixup and the lane-dense (128-wide) output store.
    for (B, L, l_tile) in [(2, 8, None), (2, 80, 128)]:
        x0 = jax.random.normal(k0, (B, L, emb_s), dtype=jnp.float32)
        x1 = jax.random.normal(k1, (B, L, emb_s), dtype=jnp.float32)
        x2 = jax.random.normal(k2, (B, L, emb_s), dtype=jnp.float32)
        rel = jax.random.normal(k3, (B, L, emb_s), dtype=jnp.float32)
        for n in (0, 1, 2):
            mod = SepConv1dPallas(emb_s, n, kernel_size, padding, weight)
            out = jax.block_until_ready(mod(x0, x1, x2, rel, l_tile=l_tile))
            ref = jax.block_until_ready(
                _sepconv1d_ref(x0, x1, x2, n, weight, emb_s, padding))
            ok = ok and check(out, ref)
        # Pointwise-conv path (K == 1, no halo input).
        mod1 = SepConv1dPallas(emb_s, 0, 1, 0, weight_k1)
        out1 = jax.block_until_ready(mod1(x0, x1, x2, rel, l_tile=l_tile))
        ref1 = jax.block_until_ready(
            _sepconv1d_ref(x0, x1, x2, 0, weight_k1, emb_s, 0))
        ok = ok and check(out1, ref1)

    if ok:
        print("KERNEL_OK")
</pallas_src>

<mosaic_0001>
module attributes {stable_mosaic.version = 11 : i64} {
  func.func @_sepconv1d_kernel(%arg0: i32, %arg1: i32, %arg2: memref<1x16x32xf32, #tpu.memory_space<vmem>>, %arg3: memref<1x8x32xf32, #tpu.memory_space<vmem>>, %arg4: memref<3x32x32xf32, #tpu.memory_space<vmem>>, %arg5: memref<1x32x16xf32, #tpu.memory_space<vmem>>) attributes {dimension_semantics = [#tpu.dimension_semantics<parallel>, #tpu.dimension_semantics<parallel>], iteration_bounds = array<i64: 2, 1>, scalar_prefetch = 0 : i64, scratch_operands = 0 : i64, tpu.core_type = #tpu.core_type<tc>, window_params = [{transform_indices = @transform_0, window_bounds = array<i64: 1, 16, 32>}, {transform_indices = @transform_1, window_bounds = array<i64: 1, 8, 32>}, {pipeline_mode = #tpu.pipeline_mode<synchronous>, transform_indices = @transform_2, window_bounds = array<i64: 3, 32, 32>}, {transform_indices = @transform_3, window_bounds = array<i64: 1, 32, 16>}]} {
    %c0 = arith.constant 0 : index
    %c0_0 = arith.constant 0 : index
    %c0_1 = arith.constant 0 : index
    %0 = vector.load %arg2[%c0, %c0_0, %c0_1] : memref<1x16x32xf32, #tpu.memory_space<vmem>>, vector<1x16x32xf32>
    %1 = vector.shape_cast %0 : vector<1x16x32xf32> to vector<16x32xf32>
    %c0_2 = arith.constant 0 : index
    %c0_3 = arith.constant 0 : index
    %c0_4 = arith.constant 0 : index
    %2 = vector.load %arg4[%c0_2, %c0_3, %c0_4] : memref<3x32x32xf32, #tpu.memory_space<vmem>>, vector<1x32x32xf32>
    %3 = vector.shape_cast %2 : vector<1x32x32xf32> to vector<32x32xf32>
    %cst = arith.constant dense<0.000000e+00> : vector<16x32xf32>
    %4 = tpu.matmul %1, %3, %cst {dimension_numbers = #tpu.dot_dimension_numbers<[1], [0], [0], [1], [0, 0, 1, 1], [], []>} : vector<16x32xf32>, vector<32x32xf32>, vector<16x32xf32> -> vector<16x32xf32>
    %c15_i32 = arith.constant 15 : i32
    %5 = tpu.dynamic_rotate %1 by %c15_i32 dim 0 : vector<16x32xf32>, i32 -> vector<16x32xf32>
    %c1 = arith.constant 1 : index
    %c0_5 = arith.constant 0 : index
    %c0_6 = arith.constant 0 : index
    %6 = vector.load %arg4[%c1, %c0_5, %c0_6] : memref<3x32x32xf32, #tpu.memory_space<vmem>>, vector<1x32x32xf32>
    %7 = vector.shape_cast %6 : vector<1x32x32xf32> to vector<32x32xf32>
    %cst_7 = arith.constant dense<0.000000e+00> : vector<16x32xf32>
    %8 = tpu.matmul %5, %7, %cst_7 {dimension_numbers = #tpu.dot_dimension_numbers<[1], [0], [0], [1], [0, 0, 1, 1], [], []>} : vector<16x32xf32>, vector<32x32xf32>, vector<16x32xf32> -> vector<16x32xf32>
    %9 = arith.addf %4, %8 : vector<16x32xf32>
    %c14_i32 = arith.constant 14 : i32
    %10 = tpu.dynamic_rotate %1 by %c14_i32 dim 0 : vector<16x32xf32>, i32 -> vector<16x32xf32>
    %c2 = arith.constant 2 : index
    %c0_8 = arith.constant 0 : index
    %c0_9 = arith.constant 0 : index
    %11 = vector.load %arg4[%c2, %c0_8, %c0_9] : memref<3x32x32xf32, #tpu.memory_space<vmem>>, vector<1x32x32xf32>
    %12 = vector.shape_cast %11 : vector<1x32x32xf32> to vector<32x32xf32>
    %cst_10 = arith.constant dense<0.000000e+00> : vector<16x32xf32>
    %13 = tpu.matmul %10, %12, %cst_10 {dimension_numbers = #tpu.dot_dimension_numbers<[1], [0], [0], [1], [0, 0, 1, 1], [], []>} : vector<16x32xf32>, vector<32x32xf32>, vector<16x32xf32> -> vector<16x32xf32>
    %14 = arith.addf %9, %13 : vector<16x32xf32>
    %15 = tpu.transpose %14, [1, 0] : vector<16x32xf32> -> vector<32x16xf32>
    %c0_11 = arith.constant 0 : index
    %c0_12 = arith.constant 0 : index
    %c0_13 = arith.constant 0 : index
    %16 = vector.load %arg5[%c0_11, %c0_12, %c0_13] : memref<1x32x16xf32, #tpu.memory_space<vmem>>, vector<1x32x16xf32>
    %17 = vector.shape_cast %16 : vector<1x32x16xf32> to vector<32x16xf32>
    %18 = vector.shape_cast %15 : vector<32x16xf32> to vector<1x32x16xf32>
    tpu.vector_store %arg5[%c0_11, %c0_12, %c0_13], %18 {strides = array<i32>} : memref<1x32x16xf32, #tpu.memory_space<vmem>>, vector<1x32x16xf32>,
    %c0_14 = arith.constant 0 : index
    %c0_15 = arith.constant 0 : index
    %c0_16 = arith.constant 0 : index
    %19 = vector.load %arg3[%c0_14, %c0_15, %c0_16] : memref<1x8x32xf32, #tpu.memory_space<vmem>>, vector<1x8x32xf32>
    %20 = vector.shape_cast %19 : vector<1x8x32xf32> to vector<8x32xf32>
    %21 = vector.extract_strided_slice %1 {offsets = [0, 0], sizes = [8, 32], strides = [1, 1]} : vector<16x32xf32> to vector<8x32xf32>
    %22 = arith.subf %20, %21 : vector<8x32xf32>
    %23 = tpu.iota {dimensions = array<i32: 0>} : vector<8x1xi32>
    %cst_17 = arith.constant 0.000000e+00 : f32
    %24 = vector.broadcast %cst_17 : f32 to vector<8x32xf32>
    %c7_i32 = arith.constant 7 : i32
    %25 = tpu.dynamic_rotate %22 by %c7_i32 dim 0 : vector<8x32xf32>, i32 -> vector<8x32xf32>
    %c7_i32_18 = arith.constant 7 : i32
    %26 = vector.broadcast %c7_i32_18 : i32 to vector<8x1xi32>
    %27 = arith.cmpi sge, %23, %26 : vector<8x1xi32>
    %cst_19 = arith.constant 0.000000e+00 : f32
    %28 = vector.broadcast %cst_19 : f32 to vector<8x32xf32>
    %29 = vector.shape_cast %27 : vector<8x1xi1> to vector<8x1xi1>
    %30 = vector.broadcast %29 : vector<8x1xi1> to vector<8x32xi1>
    %31 = arith.select %30, %25, %28 : vector<8x32xi1>, vector<8x32xf32>
    %c1_20 = arith.constant 1 : index
    %c0_21 = arith.constant 0 : index
    %c0_22 = arith.constant 0 : index
    %32 = vector.load %arg4[%c1_20, %c0_21, %c0_22] : memref<3x32x32xf32, #tpu.memory_space<vmem>>, vector<1x32x32xf32>
    %33 = vector.shape_cast %32 : vector<1x32x32xf32> to vector<32x32xf32>
    %cst_23 = arith.constant dense<0.000000e+00> : vector<8x32xf32>
    %34 = tpu.matmul %31, %33, %cst_23 {dimension_numbers = #tpu.dot_dimension_numbers<[1], [0], [0], [1], [0, 0, 1, 1], [], []>} : vector<8x32xf32>, vector<32x32xf32>, vector<8x32xf32> -> vector<8x32xf32>
    %35 = arith.addf %24, %34 : vector<8x32xf32>
    %c6_i32 = arith.constant 6 : i32
    %36 = tpu.dynamic_rotate %22 by %c6_i32 dim 0 : vector<8x32xf32>, i32 -> vector<8x32xf32>
    %c6_i32_24 = arith.constant 6 : i32
    %37 = vector.broadcast %c6_i32_24 : i32 to vector<8x1xi32>
    %38 = arith.cmpi sge, %23, %37 : vector<8x1xi32>
    %cst_25 = arith.constant 0.000000e+00 : f32
    %39 = vector.broadcast %cst_25 : f32 to vector<8x32xf32>
    %40 = vector.shape_cast %38 : vector<8x1xi1> to vector<8x1xi1>
    %41 = vector.broadcast %40 : vector<8x1xi1> to vector<8x32xi1>
    %42 = arith.select %41, %36, %39 : vector<8x32xi1>, vector<8x32xf32>
    %c2_26 = arith.constant 2 : index
    %c0_27 = arith.constant 0 : index
    %c0_28 = arith.constant 0 : index
    %43 = vector.load %arg4[%c2_26, %c0_27, %c0_28] : memref<3x32x32xf32, #tpu.memory_space<vmem>>, vector<1x32x32xf32>
    %44 = vector.shape_cast %43 : vector<1x32x32xf32> to vector<32x32xf32>
    %cst_29 = arith.constant dense<0.000000e+00> : vector<8x32xf32>
    %45 = tpu.matmul %42, %44, %cst_29 {dimension_numbers = #tpu.dot_dimension_numbers<[1], [0], [0], [1], [0, 0, 1, 1], [], []>} : vector<8x32xf32>, vector<32x32xf32>, vector<8x32xf32> -> vector<8x32xf32>
    %46 = arith.addf %35, %45 : vector<8x32xf32>
    %47 = vector.extract_strided_slice %14 {offsets = [8, 0], sizes = [8, 32], strides = [1, 1]} : vector<16x32xf32> to vector<8x32xf32>
    %48 = arith.addf %47, %46 : vector<8x32xf32>
    %49 = tpu.transpose %48, [1, 0] : vector<8x32xf32> -> vector<32x8xf32>
    %c0_30 = arith.constant 0 : index
    %c0_31 = arith.constant 0 : index
    %c8 = arith.constant 8 : index
    %50 = vector.load %arg5[%c0_30, %c0_31, %c8] : memref<1x32x16xf32, #tpu.memory_space<vmem>>, vector<1x32x8xf32>
    %51 = vector.shape_cast %50 : vector<1x32x8xf32> to vector<32x8xf32>
    %52 = vector.shape_cast %49 : vector<32x8xf32> to vector<1x32x8xf32>
    tpu.vector_store %arg5[%c0_30, %c0_31, %c8], %52 {strides = array<i32>} : memref<1x32x16xf32, #tpu.memory_space<vmem>>, vector<1x32x8xf32>,
    return
  }
  func.func @transform_0(%arg0: i32, %arg1: i32) -> (i32, i32, i32) {
    %c0_i32 = arith.constant 0 : i32
    %c0_i32_0 = arith.constant 0 : i32
    return %arg0, %arg1, %c0_i32 : i32, i32, i32
  }
  func.func @transform_1(%arg0: i32, %arg1: i32) -> (i32, i32, i32) {
    %c1_i32 = arith.constant 1 : i32
    %0 = arith.addi %arg1, %c1_i32 : i32
    %c2_i32 = arith.constant 2 : i32
    %1 = arith.muli %0, %c2_i32 : i32
    %c0_i32 = arith.constant 0 : i32
    %c0_i32_0 = arith.constant 0 : i32
    return %arg0, %1, %c0_i32 : i32, i32, i32
  }
  func.func @transform_2(%arg0: i32, %arg1: i32) -> (i32, i32, i32) {
    %c0_i32 = arith.constant 0 : i32
    %c0_i32_0 = arith.constant 0 : i32
    %c0_i32_1 = arith.constant 0 : i32
    %c0_i32_2 = arith.constant 0 : i32
    return %c0_i32, %c0_i32_0, %c0_i32_1 : i32, i32, i32
  }
  func.func @transform_3(%arg0: i32, %arg1: i32) -> (i32, i32, i32) {
    %c0_i32 = arith.constant 0 : i32
    %c0_i32_0 = arith.constant 0 : i32
    return %arg0, %c0_i32, %arg1 : i32, i32, i32
  }
}

</mosaic_0001>

<bundles_post_ra>
// kernel: tpu_custom_call.1
= control target key start
LH: loop header
LB: loop body
LE: loop exit
PB: predicated region body
PF: predicated region fallthrough
CT: control target
= control target key end

     0   :  { %s1586_s0 = inlined_call_operand.hbm [shape: f32[2,24,32], index: 0, kind: input, shape index: {}]   ;;  %s1587_s1 = inlined_call_operand.hbm [shape: f32[2,24,32], index: 1, kind: input, shape index: {}]   ;;  %s1588_s2 = inlined_call_operand.hbm [shape: f32[3,32,32], index: 2, kind: input, shape index: {}]   ;;  %s1589_s3 = inlined_call_operand.vmem [shape: f32[2,32,16], index: 3, kind: output, shape index: {}]  }
   0x1   :  { %1595 = sst [smem:[#allocation10_spill]] %s1586_s0 }
   0x2   :  { %8 = vsyncpa [#allocation3], 0 }
   0x3   :  { %10 = vsyncpa [#allocation3 + $0x1], 0 }
   0x4   :  { %11 = vsyncpa [#allocation5], 0 }
   0x5   :  { %13 = vsyncpa [#allocation5 + $0x1], 0  ;;  %s1353_s12 = smov 0   ;;  %s1355_s13 = smov 0  }
   0x6   :  { %s1357_s14 = smov 0   ;;  %s1359_s15 = smov 0  }
   0x7   :  { %s1361_s16 = smov 0   ;;  %s1363_s17 = smov 0  }
   0x8 LB: > { %s1594_s18 = sadd.s32 4294967295, %s1322_s17   ;;  %p53_p0 = scmp.ne.s32.totalorder %s1306_s13, %s1302_s12  ;;  %s1322_s17 = sphi %s1363_s17, %s19_s17   ;;  %s1318_s16 = sphi %s1361_s16, %s1610_s16   ;;  %s1314_s15 = sphi %s1359_s15, %s1609_s15   ;;  %s1310_s14 = sphi %s1357_s14, %s1608_s14   ;;  %s1306_s13 = sphi %s1355_s13, %s1607_s13   ;;  %s1302_s12 = sphi %s1353_s12, %s1606_s12  }
   0x9   : > { %p1385_p1 = scmp.eq.s32.totalorder %s1594_s18, 0  ;;  %p950_p2 = scmp.ge.s32.totalorder %s1322_s17, 1 }
   0xa   : > { %p145_p3 = scmp.lt.s32.totalorder %s1322_s17, 3  ;;  %s1324_s22 = smov [#allocation6]  }
   0xb   : > { %s1596_s19 = scalar_select %p1385_p1, 1, 0 }
   0xc   : > { %p1393_p4 = por %p1385_p1, %p53_p0  ;;  %p1397_p5 = pnand %p950_p2, %p145_p3 }
   0xd   : > { %s157_s23 = sshll.u32 %s1324_s22, 4  ;;  %s31_s25 = sadd.s32 1, %s1318_s16  ;;  %s158_s23 = int_to_ptr.vmem [resolvable:$true] %s157_s23 }
   0xe   : > { %s1597_s20 = scalar_select %p1393_p4, 1, 0 }
   0xf   : > { %s1598_s21 = scalar_select %p1397_p5, 1, 0 }
  0x10   : > { %p1106_p6 = pneg %p1397_p5  ;;  %s1175_s28 = scalar_lea.hbm %s1588_s2, 1536 }
  0x11   : > { %p1176_p8 = scmp.ne.s32.totalorder %s1588_s2, %s1175_s28  ;;  %p1182_p12 = scmp.lt.u32.totalorder %s1175_s28, %s1588_s2 }
  0x12   : > { %p1405_p7 = pnand %p1106_p6, %p1385_p1 }
  0x14   : > { %p1177_p9 = pneg %p1405_p7 }
  0x16   : > { %p1178_p10 = pnand %p1177_p9, %p1176_p8 }
  0x18   : > { %p1179_p11 = pneg %p1178_p10 }
  0x1a   : > { %p1184_p13 = pnand %p1182_p12, %p1179_p11 }
  0x1c   : > { %1187 = shalt.err (!%p1184_p13)
}
  0x1d   : > { %s1188_s6 = scalar_lea.vmem %s158_s23, 1536  ;;  %p1196_p6 = scmp.lt.s32.totalorder %s158_s23, %s158_s23 }
  0x1e   : > { %p1189_p0 = scmp.ne.s32.totalorder %s158_s23, %s1188_s6  ;;  %p1197_p1 = scmp.lt.s32.totalorder %s1188_s6, %s1188_s6 }
  0x20   : > { %p1191_p2 = pnand %p1189_p0, %p1177_p9  ;;  %p1198_p4 = por %p1197_p1, %p1196_p6 }
  0x22   : > { %p1192_p3 = pneg %p1191_p2 }
  0x24   : > { %p1199_p5 = pnand %p1198_p4, %p1192_p3 }
  0x26   : > { %1202 = shalt.err (!%p1199_p5)
}
  0x27   : > { %s1325_s7 = smov 128   ;;  %s1326_s8 = smov 8  }
  0x28   : > { %1109 = dma.hbm_to_vmem [thread:$0]  (!%p1405_p7), %s1588_s2, 1536, %s158_s23, [#allocation5], %s1325_s7, %s1325_s7, %s1326_s8  }
  0x29   : > { %p33_p1 = scmp.ge.s32.totalorder %s31_s25, 2  ;;  %s40_s11 = sadd.s32 1, %s1310_s14 }
  0x2a   : > { %p47_p4 = scmp.ne.s32.totalorder %s1310_s14, %s1306_s13  ;;  %p48_p5 = scmp.eq.s32.totalorder %s1322_s17, 0 }
  0x2b   : > { %s1612_s25 = smov (%p33_p1, %s31_s25), 0  ;;  %p1118_p9 = scmp.lt.s32.totalorder %s1322_s17, 2 }
  0x2c   : > { %p49_p8 = por %p48_p5, %p47_p4  ;;  %s35_s12 = ssub.s32 %s1318_s16, %s1612_s25 }
  0x2d   : > { %s1439_s22 = sand.u32 1, %s1310_s14   ;;  %p38_p10 = scmp.eq.s32.totalorder %s35_s12, 0 }
  0x2e   : > { %s953_s24 = sshll.u32 %s1439_s22, 4  ;;  %s1097_s26 = smul.u32 384, %s1318_s16 }
  0x2f   : > { %s1444_s27 = scalar_select %p38_p10, %s1310_s14, %s40_s11  }
  0x30   : > { %s1600_s0 = sld [smem:[#allocation10_spill]]  ;;  %s175_s30 = scalar_lea.vmem [#allocation2], %s953_s24 }
  0x31   : > { %s190_s4 = sshll.u32 %s175_s30, 4  ;;  %p1453_p7 = pnand %p1118_p9, %p49_p8  ;;  %s1457_s4 = int_to_ptr.vmem [resolvable:$true] %s190_s4 }
  0x32   : > { %s200_s6 = sand.u32 1, %s1322_s17   ;;  %s172_s9 = scalar_lea.sflag [#allocation3], %s1439_s22 }
  0x33   : > { %p1205_p12 = pneg %p1453_p7 }
  0x36   : > { %s1451_s29 = scalar_lea.hbm %s1600_s0, %s1097_s26  ;;  %s1208_s24 = scalar_lea.hbm %s1600_s0, 768 }
  0x37   : > { %s1203_s10 = scalar_lea.hbm %s1451_s29, 256  ;;  %p1209_p2 = scmp.lt.u32.totalorder %s1451_s29, %s1600_s0 }
  0x38   : > { %p1204_p11 = scmp.ne.s32.totalorder %s1451_s29, %s1203_s10  ;;  %p1210_p3 = scmp.lt.u32.totalorder %s1208_s24, %s1203_s10 }
  0x39   : > { %p1212_p1 = scmp.lt.u32.totalorder %s1203_s10, %s1451_s29 }
  0x3a   : > { %p1206_p13 = pnand %p1205_p12, %p1204_p11  ;;  %p1211_p6 = por %p1210_p3, %p1209_p2 }
  0x3c   : > { %p1207_p0 = pneg %p1206_p13  ;;  %p1213_p4 = por %p1212_p1, %p1211_p6 }
  0x3e   : > { %p1214_p5 = pnand %p1213_p4, %p1207_p0 }
  0x40   : > { %1217 = shalt.err (!%p1214_p5)
}
  0x41   : > { %s1218_s30 = scalar_lea.vmem %s1457_s4, 256  ;;  %s1327_s11 = smov [#allocation2]  }
  0x42   : > { %p1219_p8 = scmp.ne.s32.totalorder %s1457_s4, %s1218_s30  ;;  %s1223_s12 = sshll.u32 %s1327_s11, 4  ;;  %s1224_s12 = int_to_ptr.vmem [resolvable:$false] %s1223_s12 }
  0x43   : > { %s1225_s23 = scalar_lea.vmem %s1224_s12, 512  ;;  %p1226_p11 = scmp.lt.s32.totalorder %s1457_s4, %s1224_s12 }
  0x44   : > { %p1221_p9 = pnand %p1219_p8, %p1205_p12  ;;  %p1227_p13 = scmp.lt.s32.totalorder %s1225_s23, %s1218_s30 }
  0x46   : > { %p1222_p10 = pneg %p1221_p9  ;;  %p1228_p2 = por %p1227_p13, %p1226_p11 }
  0x48   : > { %p1229_p3 = pnand %p1228_p2, %p1222_p10 }
  0x4a   : > { %1232 = shalt.err (!%p1229_p3)
}
  0x4b   : > { %1113 = dma.hbm_to_vmem [thread:$0]  (!%p1453_p7), %s1451_s29, 256, %s1457_s4, %s172_s9, %s1325_s7, %s1325_s7, %s1326_s8  }
  0x4c   : > { %s955_s10 = sshll.u32 %s1439_s22, 3  ;;  %s868_s30 = scalar_lea.hbm %s1587_s1, %s1097_s26 }
  0x4d   : > { %s1497_s11 = scalar_lea.hbm %s868_s30, 256  ;;  %s204_s12 = scalar_lea.vmem [#allocation4], %s955_s10 }
  0x4e   : > { %s215_s23 = sshll.u32 %s204_s12, 4  ;;  %s201_s18 = scalar_lea.sflag [#allocation5], %s200_s6  ;;  %s216_s23 = int_to_ptr.vmem [resolvable:$true] %s215_s23 }
  0x4f   : > { %s1263_s0 = scalar_lea.hbm %s868_s30, 384  ;;  %s1238_s22 = scalar_lea.hbm %s1587_s1, 768 }
  0x50   : > { %p1234_p0 = scmp.ne.s32.totalorder %s1497_s11, %s1263_s0  ;;  %p1239_p4 = scmp.lt.u32.totalorder %s1497_s11, %s1587_s1 }
  0x51   : > { %p1240_p5 = scmp.lt.u32.totalorder %s1238_s22, %s1263_s0  ;;  %p1242_p9 = scmp.lt.u32.totalorder %s1263_s0, %s1497_s11 }
  0x52   : > { %p1236_p6 = pnand %p1234_p0, %p1205_p12 }
  0x53   : > { %p1241_p8 = por %p1240_p5, %p1239_p4 }
  0x54   : > { %p1237_p1 = pneg %p1236_p6 }
  0x55   : > { %p1243_p10 = por %p1242_p9, %p1241_p8 }
  0x57   : > { %p1244_p11 = pnand %p1243_p10, %p1237_p1 }
  0x59   : > { %1247 = shalt.err (!%p1244_p11)
}
  0x5a   : > { %s1248_s4 = scalar_lea.vmem %s216_s23, 128  ;;  %s1328_s6 = smov [#allocation4]  }
  0x5b   : > { %p1249_p13 = scmp.ne.s32.totalorder %s216_s23, %s1248_s4  ;;  %s1253_s9 = sshll.u32 %s1328_s6, 4  ;;  %s1254_s9 = int_to_ptr.vmem [resolvable:$false] %s1253_s9 }
  0x5c   : > { %s1255_s10 = scalar_lea.vmem %s1254_s9, 256  ;;  %p1256_p0 = scmp.lt.s32.totalorder %s216_s23, %s1254_s9 }
  0x5d   : > { %p1251_p2 = pnand %p1249_p13, %p1205_p12  ;;  %p1257_p6 = scmp.lt.s32.totalorder %s1255_s10, %s1248_s4 }
  0x5f   : > { %p1252_p3 = pneg %p1251_p2  ;;  %p1258_p4 = por %p1257_p6, %p1256_p0 }
  0x61   : > { %p1259_p5 = pnand %p1258_p4, %p1252_p3 }
  0x63   : > { %1262 = shalt.err (!%p1259_p5)
}
  0x64   : > { %1116 = dma.hbm_to_vmem [thread:$0]  (!%p1453_p7), %s1497_s11, 128, %s216_s23, %s201_s18  }
  0x65   : > { %p1602_p1 = scmp.ne.s32.totalorder %s1598_s21, 0 }
  0x66   : > { %s226_s0 = sand.u32 (!%p1602_p1), 1, %s1306_s13   ;;  %p1603_p12 = scmp.ne.s32.totalorder (!%p1602_p1), %s1597_s20, 0 }
  0x67   : > { %224 = sbr.rel (%p1602_p1) target bundleno = 685 (0x2ad), region = 32  ;;  %s958_s24 = sshll.u32 (!%p1602_p1), %s226_s0, 4 }
  0x68   : > { %s227_s28 = scalar_lea.sflag (!%p1602_p1), [#allocation3], %s226_s0  ;;  %s1522_s30 = scalar_lea.vmem (!%p1602_p1), [#allocation2], %s958_s24 }
  0x6e   : > { %1289 = dma.done.wait (%p1603_p12), %s227_s28, 256  }
  0x6f   : > { %1291 = vsyncadd (%p1603_p12), %s227_s28, 4294967040  ;;  %s1604_s12 = sadd.s32 4294967295, %s1322_s17   ;;  %s959_s18 = sshll.u32 %s226_s0, 3 }
  0x70   : > { %s235_s5 = sand.u32 1, %s1604_s12   ;;  %s1530_s21 = scalar_lea.vmem [#allocation4], %s959_s18 }
  0x71   : > { %s236_s11 = scalar_lea.sflag [#allocation5], %s235_s5 }
  0x72   : > { %1293 = dma.done.wait (%p1603_p12), %s236_s11, 128  }
  0x73   : > { %1295 = vsyncadd (%p1603_p12), %s236_s11, 4294967168  ;;  %p1605_p7 = scmp.ne.s32.totalorder %s1596_s19, 0 }
  0x75   : > { %1297 = dma.done.wait (%p1605_p7), [#allocation5], 1536  }
  0x76   : > { %1299 = vsyncadd (%p1605_p7), [#allocation5], 4294965760  ;;  %v1329_v0 = vmov 0.0|0.0   ;;  %v297_v1 = vlaneseq  ;;  %vm1330_vm0 = vmmov 0   ;;  %v1331_v2 = vmov 0.0   ;;  %v303_v4 = vld [vmem:[#allocation6 + $0x20] sm:$0xff] }
  0x77   : > { %1081 = vmatprep.subr.bf16.mxu1 %v1329_v0  ;;  %1043 = vmatprep.mubr.msk.f32.mxu1 %vm1330_vm0, %v1331_v2  ;;  %v304_v5 = vld [vmem:[#allocation6 + $0x28] sm:$0xff]  ;;  %v616_v6 = vld [vmem:[#allocation6 + $0x40] sm:$0xff]  ;;  %v305_v9 = vld [vmem:[#allocation6 + $0x30] sm:$0xff]  ;;  %vm307_vm2 = vcmask 261120   ;;  %s1332_s19 = smov 8   ;;  %p281_p8 = scmp.lt.s32.totalorder %s1314_s15, 1 }
  0x78   : > { %v1541_v3 = vshrl.u32 %v297_v1, 7  ;;  %v1057_v7 = vpack.c.bf16 %v304_v5, %v303_v4  ;;  %v617_v8 = vld [vmem:[#allocation6 + $0x48] sm:$0xff]  ;;  %v306_v10 = vld [vmem:[#allocation6 + $0x38] sm:$0xff]  ;;  %v618_v13 = vld [vmem:[#allocation6 + $0x50] sm:$0xff]  ;;  %vm595_vm6 = vcmask 130048   ;;  %vm815_vm7 = vcmask 130112  }
  0x79   : > { %v1082_v11 = vpack.c.bf16 %v617_v8, %v616_v6  ;;  %v1061_v12 = vpack.c.bf16 %v306_v10, %v305_v9  ;;  %v619_v14 = vld [vmem:[#allocation6 + $0x58] sm:$0xff]  ;;  %v289_v15 = vld [vmem:[%s1522_s30] sm:$0xff]  ;;  %v292_v19 = vld [vmem:[#allocation6 + $0x8] sm:$0xff]  ;;  %s1614_s15 = smov (!%p281_p8, %s1314_s15), 1 }
  0x7a   : > { %1058 = vmatprep.subr.bf16.mxu0 %v1057_v7  ;;  %v290_v16 = vld [vmem:[%s1522_s30 + $0x8] sm:$0xff]  ;;  %v295_v17 = vrot.slane %v289_v15, 1  ;;  %vm299_vm1 = vcmp.lt.s32.totalorder %v1541_v3, 7  ;;  %v291_v18 = vld [vmem:[#allocation6] sm:$0xff]  ;;  %v1085_v20 = vpack.c.bf16 %v619_v14, %v618_v13  ;;  %v600_v22 = vld [vmem:[%s1530_s21] sm:$0xff]  ;;  %vm612_vm3 = vcmp.ge.s32.totalorder %v1541_v3, 6 }
  0x7b   : > { %1060 = vmatpush3.bf16.msra.mxu0 %v1057_v7  ;;  %1083 = vmatpush3.bf16.msra.mxu1 %v1082_v11  ;;  %v296_v21 = vrot.slane %v290_v16, 1  ;;  %v1065_v23 = vpack.c.bf16 %v292_v19, %v291_v18  ;;  %v601_v24 = vsub.f32 %v600_v22, %v289_v15  ;;  %v293_v26 = vld [vmem:[#allocation6 + $0x10] sm:$0xff]  ;;  %v294_v27 = vld [vmem:[#allocation6 + $0x18] sm:$0xff]  ;;  %vm603_vm4 = vcmp.ge.s32.totalorder %v1541_v3, 7  ;;  %s973_s20 = sshll.u32 %s1614_s15, 5 }
  0x7c   : > { %1062 = vmatprep.subr.bf16.mxu0 %v1061_v12  ;;  %1084 = vmatprep.subr.bf16.mxu1 %v1329_v0  ;;  %v1069_v31 = vpack.c.bf16 %v294_v27, %v293_v26  ;;  %v470_v33 = vrot.slane %v289_v15, 2  ;;  %v471_v34 = vrot.slane %v290_v16, 2  ;;  %vm472_vm5 = vcmp.lt.s32.totalorder %v1541_v3, 6  ;;  %s288_s8 = scalar_lea.vmem %s1589_s3, %s973_s20 }
  0x7d   : > { %v300_v25 = vsel %vm299_vm1, %v295_v17, %v296_v21  ;;  %v611_v28 = vrot.slane %v601_v24, 2  ;;  %v301_v29 = vsel %vm299_vm1, %v296_v21, %v295_v17  ;;  %v602_v32 = vrot.slane %v601_v24, 1 }
  0x7e   : > { %1010 = vmatprep.mubr.msk.f32.mxu0 %vm307_vm2, %v300_v25  ;;  %v473_v36 = vsel %vm472_vm5, %v470_v33, %v471_v34  ;;  %v474_v37 = vsel %vm472_vm5, %v471_v34, %v470_v33 }
  0x7f   : > { %1064 = vmatpush3.bf16.msra.mxu0 %v1061_v12  ;;  %1086 = vmatpush3.bf16.msra.mxu1 %v1085_v20  ;;  %v615_v30 = vsel %vm612_vm3, %v611_v28, 0.0  ;;  %v606_v35 = vsel %vm603_vm4, %v602_v32, 0.0 }
  0x80   : > { %1066 = vmatprep.subr.bf16.mxu0 %v1065_v23  ;;  %1087 = vmatprep.subr.bf16.mxu1 %v1329_v0 }
  0x82   : > { %1011 = vmatmul.mubr.msk.f32.vlgmr.msra.gmra.mrb[0].mxu0 %vm307_vm2, %v301_v29  ;;  %1044 = vmatmul.mubr.msk.f32.vlgmr.msra.gmra.mrb[0].mxu1 %vm307_vm2, %v615_v30 }
  0x83   : > { %1068 = vmatpush3.bf16.msra.mxu0 %v1065_v23  ;;  %1089 = vmatpush3.bf16.msra.mxu1 %v1057_v7 }
  0x84   : > { %1070 = vmatprep.subr.bf16.mxu0 %v1069_v31  ;;  %1090 = vmatprep.subr.bf16.mxu1 %v1329_v0 }
  0x85   : > { %1021 = vmatprep.mubr.msk.f32.mxu0 %vm307_vm2, %v289_v15  ;;  %1054 = vmatprep.mubr.msk.f32.mxu1 %vm1330_vm0, %v1331_v2 }
  0x87   : > { %1072 = vmatpush3.bf16.msra.mxu0 %v1069_v31  ;;  %1092 = vmatpush3.bf16.msra.mxu1 %v1061_v12 }
  0x88   : > { %1074 = vmatprep.subr.bf16.mxu0 %v1082_v11 }
  0x8a   : > { %1022 = vmatmul.mubr.msk.f32.vlgmr.msra.gmra.mrb[0].mxu0 %vm307_vm2, %v290_v16  ;;  %1055 = vmatmul.mubr.msk.f32.vlgmr.msra.gmra.mrb[2].mxu1 %vm307_vm2, %v606_v35 }
  0x8b   : > { %1076 = vmatpush3.bf16.msra.mxu0 %v1082_v11  ;;  %1032 = vmatprep.mubr.msk.f32.mxu0 %vm307_vm2, %v473_v36 }
  0x8c   : > { %1078 = vmatprep.subr.bf16.mxu0 %v1085_v20 }
  0x8f   : > { %1080 = vmatpush3.bf16.msra.mxu0 %v1085_v20 }
  0x92   : > { %1033 = vmatmul.mubr.msk.f32.vlgmr.msra.gmra.mrb[0].mxu0 %vm307_vm2, %v474_v37 }
 0x155   : > { %v689_v38 = vpop.f32.mrb[0].mxu1 }
 0x156   : > { %v1045_v39 = vpop.f32.mrb[1].mxu1 }
 0x15d   : > { %v762_v40 = vpop.f32.mrb[2].mxu1 }
 0x15e   : > { %v763_v41 = vadd.f32 %v762_v40, %v689_v38  ;;  %v1056_v42 = vpop.f32.mrb[3].mxu1 }
 0x165   : > { %v1034_v43 = vpop.f32.mrb[0].mxu0 }
 0x166   : > { %v552_v44 = vpop.f32.mrb[1].mxu0  ;;  %v766_v45 = vadd.f32 %v1034_v43, %v763_v41 }
 0x168   : > { %767 = vxpose.xlu0.b32.start.end [1/1] (short) (narrow) %v766_v45, 32 }
 0x1e8   : > { %v783_v46 = vpop.trf.xlu0 }
 0x1e9   : > { %803 = vrot.lane.b32.xlu0 %v783_v46, %s1332_s19 }
 0x1ec   : > { %v784_v47 = vpop.trf.xlu0 }
 0x1ed   : > { %805 = vrot.lane.b32.xlu1 %v784_v47, %s1332_s19 }
 0x1f0   : > { %v785_v48 = vpop.trf.xlu0 }
 0x1f1   : > { %807 = vrot.lane.b32.xlu1 %v785_v48, %s1332_s19 }
 0x1f4   : > { %v786_v49 = vpop.trf.xlu0 }
 0x1f5   : > { %809 = vrot.lane.b32.xlu1 %v786_v49, %s1332_s19 }
 0x21e   : > { %563 = vxpose.xlu1.b32.start [1/2] (short) (narrow) %v552_v44, 32 }
 0x222   : > { %564 = vxpose.xlu1.b32.end [2/2] (short) (narrow) %v1034_v43, 32 }
 0x25b   : > { %v804_v54 = vpop.permute.xlu0 %803 }
 0x25f   : > { %v806_v50 = vpop.permute.xlu1 %805 }
 0x263   : > { %v808_v51 = vpop.permute.xlu1 %807 }
 0x267   : > { %v810_v52 = vpop.permute.xlu1 %809 }
 0x29e   : > { %v579_v53 = vpop.trf.xlu1 }
 0x29f   : > { %596 = vst.msk [vmem:[%s288_s8] sm:$0xff] %vm595_vm6, %v579_v53 }
 0x2a0   : > { %816 = vst.msk [vmem:[%s288_s8] sm:$0xff] %vm815_vm7, %v804_v54 }
 0x2a2   : > { %v580_v55 = vpop.trf.xlu1 }
 0x2a3   : > { %597 = vst.msk [vmem:[%s288_s8 + $0x8] sm:$0xff] %vm595_vm6, %v580_v55 }
 0x2a4   : > { %817 = vst.msk [vmem:[%s288_s8 + $0x8] sm:$0xff] %vm815_vm7, %v806_v50 }
 0x2a6   : > { %v581_v56 = vpop.trf.xlu1 }
 0x2a7   : > { %598 = vst.msk [vmem:[%s288_s8 + $0x10] sm:$0xff] %vm595_vm6, %v581_v56 }
 0x2a8   : > { %818 = vst.msk [vmem:[%s288_s8 + $0x10] sm:$0xff] %vm815_vm7, %v808_v51 }
 0x2aa   : > { %v582_v57 = vpop.trf.xlu1 }
 0x2ab   : > { %599 = vst.msk [vmem:[%s288_s8 + $0x18] sm:$0xff] %vm595_vm6, %v582_v57 }
 0x2ac   : > { %819 = vst.msk [vmem:[%s288_s8 + $0x18] sm:$0xff] %vm815_vm7, %v810_v52 }
 0x2ad PF: > { %s19_s17 = sadd.s32 1, %s1322_s17   ;;  %s1606_s12 = smov %s1306_s13 }
 0x2ae   : > { %p16_p9 = scmp.ge.s32.totalorder %s19_s17, 4   ;;  %s1607_s13 = smov %s1310_s14 }
 0x2af   : > { %s1608_s14 = smov %s1444_s27  ;;  %s1609_s15 = smov %s1318_s16 }
 0x2b0   : > { %s1610_s16 = smov %s1612_s25  ;;  %18 = sbr.rel (!%p16_p9) target bundleno = 8 (0x8), region = 91 }
 0x2b7   :  { %847 = vsyncpa [#allocation3], 1 }
 0x2b8   :  { %849 = vsyncpa [#allocation3 + $0x1], 1 }
 0x2b9   :  { %850 = vsyncpa [#allocation5], 1 }
 0x2ba   :  { %852 = vsyncpa [#allocation5 + $0x1], 1 }

</bundles_post_ra>
